<compile_context>
chip_gen: v7x
topology: tpu7x:2x2x1
jax: 0.10.0
libtpu: 0.0.40
codegen_flags: <defaults>
</compile_context>

<pallas_src>
import math

import jax
import jax.numpy as jnp
from jax.experimental import pallas as pl
from jax.experimental.pallas import tpu as pltpu

NUM_CLASSES = 256
LOG_SCALE_MIN = -16.0
_LOG_HALF_RANGE = math.log((NUM_CLASSES - 1) / 2.0)
_HALF_BIN = 1.0 / (NUM_CLASSES - 1)


def _softplus(x):
    # Numerically stable softplus, elementwise (VPU/EUP friendly).
    return jnp.maximum(x, 0.0) + jnp.log(1.0 + jnp.exp(-jnp.abs(x)))


def _dml_loss_kernel(yhat_ref, y_ref, out_ref):
    """Per-timestep discretized mixture-of-logistics NLL for one (batch, time-tile) block.

    yhat_ref: (1, 3, nr_mix, tile_t)  — [logits, means, log_scales] stacked on axis 1
    y_ref:    (1, 1, tile_t)          — target, broadcast over the mixture (sublane) axis
    out_ref:  (1, 1, tile_t)          — -logsumexp(log_probs) per timestep (lane-dense)
    """
    logit_probs = yhat_ref[0, 0, :, :]                         # (nr_mix, tile_t)
    means = yhat_ref[0, 1, :, :]                               # (nr_mix, tile_t)
    log_scales = jnp.maximum(yhat_ref[0, 2, :, :], LOG_SCALE_MIN)
    y = y_ref[0, :, :]                                         # (1, tile_t)

    centered_y = y - means
    inv_stdv = jnp.exp(-log_scales)

    plus_in = inv_stdv * (centered_y + _HALF_BIN)
    min_in = inv_stdv * (centered_y - _HALF_BIN)
    mid_in = inv_stdv * centered_y

    sp_plus = _softplus(plus_in)
    sp_min = _softplus(min_in)
    sp_mid = _softplus(mid_in)

    log_cdf_plus = plus_in - sp_plus           # = log(sigmoid(plus_in))
    log_one_minus_cdf_min = -sp_min            # = log(1 - sigmoid(min_in))
    cdf_plus = jnp.exp(log_cdf_plus)           # = sigmoid(plus_in), no inf intermediate
    cdf_min = jnp.exp(min_in - sp_min)         # = sigmoid(min_in)
    cdf_delta = cdf_plus - cdf_min
    log_pdf_mid = mid_in - log_scales - 2.0 * sp_mid

    # Same branch semantics as the PyTorch reference (selects instead of float-mask blends).
    inner_inner_out = jnp.where(
        cdf_delta > 1e-5,
        jnp.log(jnp.maximum(cdf_delta, 1e-12)),
        log_pdf_mid - _LOG_HALF_RANGE,
    )
    inner_out = jnp.where(y > 0.999, log_one_minus_cdf_min, inner_inner_out)
    log_probs = jnp.where(y < -0.999, log_cdf_plus, inner_out)

    # log_softmax over the mixture (sublane) axis.
    m_logit = jnp.max(logit_probs, axis=0, keepdims=True)
    lse_logit = m_logit + jnp.log(
        jnp.sum(jnp.exp(logit_probs - m_logit), axis=0, keepdims=True))
    log_probs = log_probs + (logit_probs - lse_logit)

    # -logsumexp over the mixture axis -> per-timestep NLL, lane-dense store.
    m = jnp.max(log_probs, axis=0, keepdims=True)
    lse = m + jnp.log(jnp.sum(jnp.exp(log_probs - m), axis=0, keepdims=True))
    out_ref[0, :, :] = -lse


def discretized_mix_logistic_loss_pallas(y_hat, y, *, max_tile_t=2048):
    """y_hat: (B, C, T) with C = 3*nr_mix; y: (B, T, 1). Returns per-sample losses (B, T, 1)."""
    B, C, T = y_hat.shape
    assert C % 3 == 0
    nr_mix = C // 3

    # Free (bitcast-style) reshapes only — no transpose, no column slicing, no extra HBM pass.
    yh = y_hat.astype(jnp.float32).reshape(B, 3, nr_mix, T)
    yt = y.astype(jnp.float32).reshape(B, 1, T)

    if T <= max_tile_t:
        tile_t = T                     # full-extent block along T: always a legal block shape
        t_pad = T
    else:
        tile_t = max_tile_t            # multiple of 128 (lane-aligned)
        t_pad = pl.cdiv(T, tile_t) * tile_t

    if t_pad != T:
        # Ragged tail: pad T (zeros are numerically benign) and slice the result back.
        pad = t_pad - T
        yh = jnp.pad(yh, ((0, 0), (0, 0), (0, 0), (0, pad)))
        yt = jnp.pad(yt, ((0, 0), (0, 0), (0, pad)))

    grid = (B, t_pad // tile_t)

    losses = pl.pallas_call(
        _dml_loss_kernel,
        out_shape=jax.ShapeDtypeStruct((B, 1, t_pad), jnp.float32),
        grid_spec=pltpu.PrefetchScalarGridSpec(
            num_scalar_prefetch=0,
            grid=grid,
            in_specs=[
                pl.BlockSpec((1, 3, nr_mix, tile_t), lambda b, t: (b, 0, 0, t)),
                pl.BlockSpec((1, 1, tile_t), lambda b, t: (b, 0, t)),
            ],
            out_specs=pl.BlockSpec((1, 1, tile_t), lambda b, t: (b, 0, t)),
        ),
        compiler_params=pltpu.CompilerParams(
            dimension_semantics=("parallel", "parallel")),
    )(yh, yt)

    return losses[:, 0, :T].reshape(B, T, 1)


def discretized_mixture_logistic_loss_module(input, target):
    """Forward pass of DiscretizedMixturelogisticLoss: mean of per-sample NLL."""
    losses = discretized_mix_logistic_loss_pallas(input, target)
    assert losses.shape == target.shape
    return jnp.mean(losses)


def _reference_loss(y_hat, y):
    """Pure-JAX reference of the PyTorch forward (for correctness checking)."""
    B, C, T = y_hat.shape
    nr_mix = C // 3
    yh = jnp.transpose(y_hat, (0, 2, 1))
    logit_probs = yh[:, :, :nr_mix]
    means = yh[:, :, nr_mix:2 * nr_mix]
    log_scales = jnp.maximum(yh[:, :, 2 * nr_mix:3 * nr_mix], LOG_SCALE_MIN)
    yb = jnp.broadcast_to(y, means.shape)
    centered = yb - means
    inv_stdv = jnp.exp(-log_scales)
    plus_in = inv_stdv * (centered + 1.0 / (NUM_CLASSES - 1))
    min_in = inv_stdv * (centered - 1.0 / (NUM_CLASSES - 1))
    cdf_plus = jax.nn.sigmoid(plus_in)
    cdf_min = jax.nn.sigmoid(min_in)
    log_cdf_plus = plus_in - jax.nn.softplus(plus_in)
    log_one_minus_cdf_min = -jax.nn.softplus(min_in)
    cdf_delta = cdf_plus - cdf_min
    mid_in = inv_stdv * centered
    log_pdf_mid = mid_in - log_scales - 2.0 * jax.nn.softplus(mid_in)
    iic = (cdf_delta > 1e-5).astype(jnp.float32)
    iio = iic * jnp.log(jnp.maximum(cdf_delta, 1e-12)) + (1.0 - iic) * (
        log_pdf_mid - jnp.log((NUM_CLASSES - 1) / 2.0))
    ic = (yb > 0.999).astype(jnp.float32)
    io = ic * log_one_minus_cdf_min + (1.0 - ic) * iio
    c = (yb < -0.999).astype(jnp.float32)
    log_probs = c * log_cdf_plus + (1.0 - c) * io
    log_probs = log_probs + jax.nn.log_softmax(logit_probs, axis=-1)
    losses = -jax.scipy.special.logsumexp(log_probs, axis=-1, keepdims=True)
    return jnp.mean(losses)


if __name__ == "__main__":
    key = jax.random.PRNGKey(0)

    # Small primary shape consistent with the forward: B x C x T input, B x T x 1 target.
    B, nr_mix, T = 2, 10, 16
    C = 3 * nr_mix
    k1, k2, k3, k4 = jax.random.split(key, 4)
    y_hat = jax.random.normal(k1, (B, C, T), dtype=jnp.float32)
    target = jax.random.uniform(k2, (B, T, 1), dtype=jnp.float32, minval=-1.0, maxval=1.0)

    loss = discretized_mixture_logistic_loss_module(y_hat, target)
    jax.block_until_ready(loss)
    ref = _reference_loss(y_hat, target)
    assert jnp.isfinite(loss), "kernel produced non-finite loss"
    assert jnp.allclose(loss, ref, rtol=1e-4, atol=1e-4), (loss, ref)

    # Second check exercising the tiled + padded-tail path (T > tile_t, T % tile_t != 0).
    B2, T2 = 1, 2200
    y_hat2 = jax.random.normal(k3, (B2, C, T2), dtype=jnp.float32)
    target2 = jax.random.uniform(k4, (B2, T2, 1), dtype=jnp.float32, minval=-1.0, maxval=1.0)
    loss2 = discretized_mixture_logistic_loss_module(y_hat2, target2)
    jax.block_until_ready(loss2)
    ref2 = _reference_loss(y_hat2, target2)
    assert jnp.isfinite(loss2), "kernel produced non-finite loss (padded path)"
    assert jnp.allclose(loss2, ref2, rtol=1e-4, atol=1e-4), (loss2, ref2)

    print("KERNEL_OK")
</pallas_src>

<mosaic_0001>
module attributes {stable_mosaic.version = 11 : i64} {
  func.func @_dml_loss_kernel(%arg0: i32, %arg1: i32, %arg2: memref<1x3x10x16xf32, #tpu.memory_space<vmem>>, %arg3: memref<1x1x16xf32, #tpu.memory_space<vmem>>, %arg4: memref<1x1x16xf32, #tpu.memory_space<vmem>>) attributes {dimension_semantics = [#tpu.dimension_semantics<parallel>, #tpu.dimension_semantics<parallel>], iteration_bounds = array<i64: 2, 1>, scalar_prefetch = 0 : i64, scratch_operands = 0 : i64, tpu.core_type = #tpu.core_type<tc>, window_params = [{transform_indices = @transform_0, window_bounds = array<i64: 1, 3, 10, 16>}, {transform_indices = @transform_1, window_bounds = array<i64: 1, 1, 16>}, {transform_indices = @transform_2, window_bounds = array<i64: 1, 1, 16>}]} {
    %c0 = arith.constant 0 : index
    %c0_0 = arith.constant 0 : index
    %c0_1 = arith.constant 0 : index
    %c0_2 = arith.constant 0 : index
    %0 = vector.load %arg2[%c0, %c0_0, %c0_1, %c0_2] : memref<1x3x10x16xf32, #tpu.memory_space<vmem>>, vector<1x1x10x16xf32>
    %1 = vector.shape_cast %0 : vector<1x1x10x16xf32> to vector<10x16xf32>
    %c0_3 = arith.constant 0 : index
    %c1 = arith.constant 1 : index
    %c0_4 = arith.constant 0 : index
    %c0_5 = arith.constant 0 : index
    %2 = vector.load %arg2[%c0_3, %c1, %c0_4, %c0_5] : memref<1x3x10x16xf32, #tpu.memory_space<vmem>>, vector<1x1x10x16xf32>
    %3 = vector.shape_cast %2 : vector<1x1x10x16xf32> to vector<10x16xf32>
    %c0_6 = arith.constant 0 : index
    %c2 = arith.constant 2 : index
    %c0_7 = arith.constant 0 : index
    %c0_8 = arith.constant 0 : index
    %4 = vector.load %arg2[%c0_6, %c2, %c0_7, %c0_8] : memref<1x3x10x16xf32, #tpu.memory_space<vmem>>, vector<1x1x10x16xf32>
    %5 = vector.shape_cast %4 : vector<1x1x10x16xf32> to vector<10x16xf32>
    %cst = arith.constant -1.600000e+01 : f32
    %6 = vector.broadcast %cst : f32 to vector<10x16xf32>
    %7 = arith.maximumf %5, %6 : vector<10x16xf32>
    %c0_9 = arith.constant 0 : index
    %c0_10 = arith.constant 0 : index
    %c0_11 = arith.constant 0 : index
    %8 = vector.load %arg3[%c0_9, %c0_10, %c0_11] : memref<1x1x16xf32, #tpu.memory_space<vmem>>, vector<1x1x16xf32>
    %9 = vector.shape_cast %8 : vector<1x1x16xf32> to vector<1x16xf32>
    %10 = vector.broadcast %9 : vector<1x16xf32> to vector<10x16xf32>
    %11 = arith.subf %10, %3 : vector<10x16xf32>
    %cst_12 = arith.constant 0.000000e+00 : f32
    %12 = vector.broadcast %cst_12 : f32 to vector<10x16xf32>
    %13 = arith.subf %12, %7 : vector<10x16xf32>
    %14 = math.exp %13 : vector<10x16xf32>
    %cst_13 = arith.constant 0.00392156886 : f32
    %15 = vector.broadcast %cst_13 : f32 to vector<10x16xf32>
    %16 = arith.addf %11, %15 : vector<10x16xf32>
    %17 = arith.mulf %14, %16 : vector<10x16xf32>
    %cst_14 = arith.constant 0.00392156886 : f32
    %18 = vector.broadcast %cst_14 : f32 to vector<10x16xf32>
    %19 = arith.subf %11, %18 : vector<10x16xf32>
    %20 = arith.mulf %14, %19 : vector<10x16xf32>
    %21 = arith.mulf %14, %11 : vector<10x16xf32>
    %cst_15 = arith.constant 0.000000e+00 : f32
    %22 = vector.broadcast %cst_15 : f32 to vector<10x16xf32>
    %23 = arith.maximumf %17, %22 : vector<10x16xf32>
    %24 = math.absf %17 : vector<10x16xf32>
    %cst_16 = arith.constant 0.000000e+00 : f32
    %25 = vector.broadcast %cst_16 : f32 to vector<10x16xf32>
    %26 = arith.subf %25, %24 : vector<10x16xf32>
    %27 = math.exp %26 : vector<10x16xf32>
    %cst_17 = arith.constant 1.000000e+00 : f32
    %28 = vector.broadcast %cst_17 : f32 to vector<10x16xf32>
    %29 = arith.addf %28, %27 : vector<10x16xf32>
    %30 = math.log %29 : vector<10x16xf32>
    %31 = arith.addf %23, %30 : vector<10x16xf32>
    %cst_18 = arith.constant 0.000000e+00 : f32
    %32 = vector.broadcast %cst_18 : f32 to vector<10x16xf32>
    %33 = arith.maximumf %20, %32 : vector<10x16xf32>
    %34 = math.absf %20 : vector<10x16xf32>
    %cst_19 = arith.constant 0.000000e+00 : f32
    %35 = vector.broadcast %cst_19 : f32 to vector<10x16xf32>
    %36 = arith.subf %35, %34 : vector<10x16xf32>
    %37 = math.exp %36 : vector<10x16xf32>
    %cst_20 = arith.constant 1.000000e+00 : f32
    %38 = vector.broadcast %cst_20 : f32 to vector<10x16xf32>
    %39 = arith.addf %38, %37 : vector<10x16xf32>
    %40 = math.log %39 : vector<10x16xf32>
    %41 = arith.addf %33, %40 : vector<10x16xf32>
    %cst_21 = arith.constant 0.000000e+00 : f32
    %42 = vector.broadcast %cst_21 : f32 to vector<10x16xf32>
    %43 = arith.maximumf %21, %42 : vector<10x16xf32>
    %44 = math.absf %21 : vector<10x16xf32>
    %cst_22 = arith.constant 0.000000e+00 : f32
    %45 = vector.broadcast %cst_22 : f32 to vector<10x16xf32>
    %46 = arith.subf %45, %44 : vector<10x16xf32>
    %47 = math.exp %46 : vector<10x16xf32>
    %cst_23 = arith.constant 1.000000e+00 : f32
    %48 = vector.broadcast %cst_23 : f32 to vector<10x16xf32>
    %49 = arith.addf %48, %47 : vector<10x16xf32>
    %50 = math.log %49 : vector<10x16xf32>
    %51 = arith.addf %43, %50 : vector<10x16xf32>
    %52 = arith.subf %17, %31 : vector<10x16xf32>
    %cst_24 = arith.constant 0.000000e+00 : f32
    %53 = vector.broadcast %cst_24 : f32 to vector<10x16xf32>
    %54 = arith.subf %53, %41 : vector<10x16xf32>
    %55 = math.exp %52 : vector<10x16xf32>
    %56 = arith.subf %20, %41 : vector<10x16xf32>
    %57 = math.exp %56 : vector<10x16xf32>
    %58 = arith.subf %55, %57 : vector<10x16xf32>
    %59 = arith.subf %21, %7 : vector<10x16xf32>
    %cst_25 = arith.constant 2.000000e+00 : f32
    %60 = vector.broadcast %cst_25 : f32 to vector<10x16xf32>
    %61 = arith.mulf %60, %51 : vector<10x16xf32>
    %62 = arith.subf %59, %61 : vector<10x16xf32>
    %cst_26 = arith.constant 9.99999974E-6 : f32
    %63 = vector.broadcast %cst_26 : f32 to vector<10x16xf32>
    %64 = arith.cmpf ogt, %58, %63 : vector<10x16xf32>
    %cst_27 = arith.constant 9.99999996E-13 : f32
    %65 = vector.broadcast %cst_27 : f32 to vector<10x16xf32>
    %66 = arith.maximumf %58, %65 : vector<10x16xf32>
    %67 = math.log %66 : vector<10x16xf32>
    %cst_28 = arith.constant 4.8481164 : f32
    %68 = vector.broadcast %cst_28 : f32 to vector<10x16xf32>
    %69 = arith.subf %62, %68 : vector<10x16xf32>
    %70 = arith.select %64, %67, %69 : vector<10x16xi1>, vector<10x16xf32>
    %cst_29 = arith.constant 9.990000e-01 : f32
    %71 = vector.broadcast %cst_29 : f32 to vector<1x16xf32>
    %72 = arith.cmpf ogt, %9, %71 : vector<1x16xf32>
    %73 = vector.shape_cast %72 : vector<1x16xi1> to vector<1x16xi1>
    %74 = vector.broadcast %73 : vector<1x16xi1> to vector<10x16xi1>
    %75 = arith.select %74, %54, %70 : vector<10x16xi1>, vector<10x16xf32>
    %cst_30 = arith.constant -9.990000e-01 : f32
    %76 = vector.broadcast %cst_30 : f32 to vector<1x16xf32>
    %77 = arith.cmpf olt, %9, %76 : vector<1x16xf32>
    %78 = vector.shape_cast %77 : vector<1x16xi1> to vector<1x16xi1>
    %79 = vector.broadcast %78 : vector<1x16xi1> to vector<10x16xi1>
    %80 = arith.select %79, %52, %75 : vector<10x16xi1>, vector<10x16xf32>
    %cst_31 = arith.constant dense<0xFF800000> : vector<16xf32>
    %81 = vector.multi_reduction <maximumf>, %1, %cst_31 [0] : vector<10x16xf32> to vector<16xf32>
    %82 = vector.shape_cast %81 : vector<16xf32> to vector<1x16xf32>
    %83 = vector.broadcast %82 : vector<1x16xf32> to vector<10x16xf32>
    %84 = arith.subf %1, %83 : vector<10x16xf32>
    %85 = math.exp %84 : vector<10x16xf32>
    %cst_32 = arith.constant dense<0.000000e+00> : vector<16xf32>
    %86 = vector.multi_reduction <add>, %85, %cst_32 [0] : vector<10x16xf32> to vector<16xf32>
    %87 = vector.shape_cast %86 : vector<16xf32> to vector<1x16xf32>
    %88 = math.log %87 : vector<1x16xf32>
    %89 = arith.addf %82, %88 : vector<1x16xf32>
    %90 = vector.broadcast %89 : vector<1x16xf32> to vector<10x16xf32>
    %91 = arith.subf %1, %90 : vector<10x16xf32>
    %92 = arith.addf %80, %91 : vector<10x16xf32>
    %cst_33 = arith.constant dense<0xFF800000> : vector<16xf32>
    %93 = vector.multi_reduction <maximumf>, %92, %cst_33 [0] : vector<10x16xf32> to vector<16xf32>
    %94 = vector.shape_cast %93 : vector<16xf32> to vector<1x16xf32>
    %95 = vector.broadcast %94 : vector<1x16xf32> to vector<10x16xf32>
    %96 = arith.subf %92, %95 : vector<10x16xf32>
    %97 = math.exp %96 : vector<10x16xf32>
    %cst_34 = arith.constant dense<0.000000e+00> : vector<16xf32>
    %98 = vector.multi_reduction <add>, %97, %cst_34 [0] : vector<10x16xf32> to vector<16xf32>
    %99 = vector.shape_cast %98 : vector<16xf32> to vector<1x16xf32>
    %100 = math.log %99 : vector<1x16xf32>
    %101 = arith.addf %94, %100 : vector<1x16xf32>
    %cst_35 = arith.constant 0.000000e+00 : f32
    %102 = vector.broadcast %cst_35 : f32 to vector<1x16xf32>
    %103 = arith.subf %102, %101 : vector<1x16xf32>
    %c0_36 = arith.constant 0 : index
    %c0_37 = arith.constant 0 : index
    %c0_38 = arith.constant 0 : index
    %104 = vector.load %arg4[%c0_36, %c0_37, %c0_38] : memref<1x1x16xf32, #tpu.memory_space<vmem>>, vector<1x1x16xf32>
    %105 = vector.shape_cast %104 : vector<1x1x16xf32> to vector<1x16xf32>
    %106 = vector.shape_cast %103 : vector<1x16xf32> to vector<1x1x16xf32>
    tpu.vector_store %arg4[%c0_36, %c0_37, %c0_38], %106 {strides = array<i32>} : memref<1x1x16xf32, #tpu.memory_space<vmem>>, vector<1x1x16xf32>,
    return
  }
  func.func @transform_0(%arg0: i32, %arg1: i32) -> (i32, i32, i32, i32) {
    %c0_i32 = arith.constant 0 : i32
    %c0_i32_0 = arith.constant 0 : i32
    %c0_i32_1 = arith.constant 0 : i32
    return %arg0, %c0_i32, %c0_i32_0, %arg1 : i32, i32, i32, i32
  }
  func.func @transform_1(%arg0: i32, %arg1: i32) -> (i32, i32, i32) {
    %c0_i32 = arith.constant 0 : i32
    %c0_i32_0 = arith.constant 0 : i32
    return %arg0, %c0_i32, %arg1 : i32, i32, i32
  }
  func.func @transform_2(%arg0: i32, %arg1: i32) -> (i32, i32, i32) {
    %c0_i32 = arith.constant 0 : i32
    %c0_i32_0 = arith.constant 0 : i32
    return %arg0, %c0_i32, %arg1 : i32, i32, i32
  }
}

</mosaic_0001>

<bundles_post_ra>
// kernel: tpu_custom_call.1
= control target key start
LH: loop header
LB: loop body
LE: loop exit
PB: predicated region body
PF: predicated region fallthrough
CT: control target
= control target key end

     0   :  { %7 = vsyncpa [#allocation3], 0  ;;  %s929_s0 = inlined_call_operand.vmem [shape: f32[2,3,10,16], index: 0, kind: input, shape index: {}]   ;;  %s930_s1 = inlined_call_operand.vmem [shape: f32[2,1,16], index: 1, kind: input, shape index: {}]   ;;  %s931_s2 = inlined_call_operand.hbm [shape: f32[2,1,16], index: 2, kind: output, shape index: {}]  }
   0x1   :  { %9 = vsyncpa [#allocation3 + $0x1], 0  ;;  %s714_s9 = smov 0   ;;  %s716_s10 = smov 0  }
   0x2   :  { %s718_s11 = smov 0   ;;  %s720_s12 = smov 0  }
   0x3   :  { %s722_s13 = smov 0   ;;  %s724_s14 = smov 0  }
   0x4 LB: > { %s491_s15 = sadd.s32 4294967295, %s695_s14   ;;  %s492_s16 = sadd.s32 4294967294, %s695_s14   ;;  %s695_s14 = sphi %s724_s14, %s15_s14   ;;  %s691_s13 = sphi %s722_s13, %s938_s13   ;;  %s687_s12 = sphi %s720_s12, %s937_s12   ;;  %s683_s11 = sphi %s718_s11, %s936_s11   ;;  %s679_s10 = sphi %s716_s10, %s935_s10   ;;  %s675_s9 = sphi %s714_s9, %s934_s9  }
   0x5   : > { %s27_s17 = sadd.s32 1, %s691_s13  ;;  %s92_s18 = sadd.s32 1, %s683_s11 }
   0x6   : > { %p29_p0 = scmp.ge.s32.totalorder %s27_s17, 2  ;;  %p102_p1 = scmp.ne.s32.totalorder %s683_s11, %s679_s10 }
   0x7   : > { %p103_p2 = scmp.eq.s32.totalorder %s491_s15, 1  ;;  %p108_p3 = scmp.ne.s32.totalorder %s679_s10, %s675_s9 }
   0x8   : > { %s940_s17 = smov (%p29_p0, %s27_s17), 0  ;;  %p109_p5 = scmp.eq.s32.totalorder %s492_s16, 1 }
   0x9   : > { %p754_p4 = por %p103_p2, %p102_p1  ;;  %s87_s20 = ssub.s32 %s691_s13, %s940_s17 }
   0xa   : > { %p495_p6 = scmp.ge.s32.totalorder %s695_s14, 1  ;;  %p90_p7 = scmp.eq.s32.totalorder %s87_s20, 0 }
   0xb   : > { %p761_p8 = por %p109_p5, %p108_p3  ;;  %p147_p9 = scmp.lt.s32.totalorder %s695_s14, 3 }
   0xc   : > { %s767_s22 = scalar_select %p90_p7, %s683_s11, %s92_s18  }
   0xd   : > { %p148_p10 = pnand %p495_p6, %p147_p9 }
   0xe   : > { %p177_p11 = scmp.lt.s32.totalorder (!%p148_p10), %s687_s12, 1  ;;  %v203_v0 = vlaneseq (!%p148_p10)  ;;  %vm332_vm0 = vcmask (!%p148_p10), 130048   ;;  %vm334_vm3 = vcmask (!%p148_p10), 123904   ;;  %v697_v6 = vmov (!%p148_p10), 0   ;;  %s175_s3 = sand.u32 (!%p148_p10), 1, %s679_s10  }
   0xf   : > { %151 = sbr.rel (%p148_p10) target bundleno = 199 (0xc7), region = 28  ;;  %s505_s4 = sshll.u32 (!%p148_p10), %s687_s12, 4  ;;  %vm393_vm8 = vcmask (!%p148_p10), 122880  }
  0x10   : > { %v204_v1 = vshrl.u32 (!%p148_p10), %v203_v0, 7  ;;  %s176_s5 = scalar_lea.vmem (!%p148_p10), [#allocation2], %s175_s3  ;;  %s882_s15 = scalar_lea.hbm (!%p148_p10), %s931_s2, %s505_s4 }
  0x11   : > { %s409_s6 = sshll.u32 (!%p148_p10), %s176_s5, 4  ;;  %s396_s16 = scalar_lea.sflag (!%p148_p10), [#allocation3], %s175_s3  ;;  %s884_s6 = int_to_ptr.vmem [resolvable:$true] %s409_s6 }
  0x12   : > { %v777_v3 = vsub.s32 (!%p148_p10), 0, %v204_v1  ;;  %s617_s18 = scalar_lea.vmem (!%p148_p10), %s884_s6, 16 }
  0x13   : > { %p618_p12 = scmp.ne.s32.totalorder (!%p148_p10), %s884_s6, %s617_s18 }
  0x15   : > { %p619_p13 = pnand (!%p148_p10), %p618_p12, %p754_p4 }
  0x16   : > { %s178_s23 = scalar_select %p177_p11, %s687_s12, 1 }
  0x17   : > { %p620_p0 = pneg %p619_p13  ;;  %s698_s12 = smov [#allocation2]  }
  0x18   : > { %s508_s24 = smul.u32 48, %s178_s23  ;;  %s190_s27 = scalar_lea.vmem %s930_s1, %s178_s23 }
  0x19   : > { %v201_v2 = vld [vmem:[%s190_s27] sm:$0x1]  ;;  %s621_s20 = sshll.u32 %s698_s12, 4  ;;  %s622_s20 = int_to_ptr.vmem [resolvable:$false] %s621_s20 }
  0x1a   : > { %s184_s30 = scalar_lea.vmem %s929_s0, %s508_s24  ;;  %vm314_vm1 = vcmp.gt.f32.partialorder %v201_v2, 0.999  ;;  %vm323_vm2 = vcmp.lt.f32.partialorder %v201_v2, -0.999  ;;  %v206_v22 = vrot.slane %v201_v2, %v777_v3  ;;  %s623_s23 = scalar_lea.vmem %s622_s20, 32 }
  0x1b   : > { %v779_v4 = vld [vmem:[%s184_s30] sm:$0xff]  ;;  %v781_v5 = vld [vmem:[%s184_s30 + $0x8] sm:$0x3]  ;;  %v783_v7 = vsel %vm314_vm1, 1, %v697_v6  ;;  %v785_v8 = vsel %vm323_vm2, 1, %v697_v6  ;;  %v497_v24 = vld [vmem:[%s184_s30 + $0x10] sm:$0xff]  ;;  %p624_p1 = scmp.lt.s32.totalorder %s884_s6, %s622_s20  ;;  %p625_p2 = scmp.lt.s32.totalorder %s623_s23, %s617_s18 }
  0x1c   : > { %v787_v9 = vld [vmem:[%s184_s30 + $0x20] sm:$0xff]  ;;  %v789_v10 = vld [vmem:[%s184_s30 + $0x28] sm:$0x3]  ;;  %v319_v11 = vrot.slane %v783_v7, %v777_v3  ;;  %v328_v12 = vrot.slane %v785_v8, %v777_v3  ;;  %v333_v15 = vsel %vm332_vm0, %v779_v4, -inf  ;;  %v335_v16 = vsel %vm334_vm3, %v781_v5, -inf }
  0x1d   : > { %v199_v13 = vmax.f32 %v787_v9, -16.0  ;;  %v200_v14 = vmax.f32 %v789_v10, -16.0  ;;  %v336_v19 = vmax.f32 %v333_v15, %v335_v16  ;;  %v498_v25 = vld [vmem:[%s184_s30 + $0x18] sm:$0x3]  ;;  %v208_v27 = vsub.f32 %v206_v22, %v497_v24  ;;  %p626_p3 = por %p625_p2, %p624_p1 }
  0x1e   : > { %v209_v29 = vsub.f32 %v206_v22, %v498_v25  ;;  %vm320_vm6 = vcmp.eq.s32.totalorder %v319_v11, 1  ;;  %vm329_vm7 = vcmp.eq.s32.totalorder %v328_v12, 1 }
  0x1f   : > { %v210_v17 = vsub.f32 0.0, %v199_v13  ;;  %v211_v18 = vsub.f32 0.0, %v200_v14  ;;  %v337_v23 = vrot.slane %v336_v19, 4  ;;  %v216_v31 = vadd.f32 0.003921569, %v208_v27  ;;  %p627_p5 = pnand %p626_p3, %p620_p0 }
  0x20   : > { %v501_v32 = vadd.f32 -0.003921569, %v208_v27  ;;  %v217_v33 = vadd.f32 0.003921569, %v209_v29  ;;  %v502_v34 = vadd.f32 -0.003921569, %v209_v29 }
  0x21   : > { %v212_v20 = vmul.f32 1.442695, %v210_v17  ;;  %v214_v21 = vmul.f32 1.442695, %v211_v18  ;;  %v338_v26 = vmax.f32 %v336_v19, %v337_v23 }
  0x23   : > { %565 = vpow2.f32 %v212_v20  ;;  %v339_v28 = vrot.slane %v338_v26, 2 }
  0x24   : > { %567 = vpow2.f32 %v214_v21 }
  0x25   : > { %v340_v30 = vmax.f32 %v338_v26, %v339_v28 }
  0x27   : > { %v341_v35 = vrot.slane %v340_v30, 1 }
  0x29   : > { %v816_v44 = vmax.f32 %v340_v30, %v341_v35 }
  0x2b   : > { %v343_v55 = vsub.f32 %v779_v4, %v816_v44  ;;  %v344_v59 = vsub.f32 %v781_v5, %v816_v44 }
  0x2d   : > { %v566_v36 = vpop.eup %565  ;;  %v345_v61 = vmul.f32 1.442695, %v343_v55  ;;  %v347_v63 = vmul.f32 1.442695, %v344_v59 }
  0x2e   : > { %v568_v37 = vpop.eup %567  ;;  %v806_v38 = vmul.f32 %v566_v36, %v216_v31  ;;  %v808_v39 = vmul.f32 %v566_v36, %v501_v32  ;;  %v818_v45 = vmul.f32 %v566_v36, %v208_v27 }
  0x2f   : > { %v810_v40 = vmul.f32 %v568_v37, %v217_v33  ;;  %v812_v41 = vmul.f32 %v568_v37, %v502_v34  ;;  %v822_v48 = vmul.f32 %v568_v37, %v209_v29 }
  0x30   : > { %v228_v42 = vand.u32 2147483647, %v806_v38  ;;  %v246_v43 = vand.u32 2147483647, %v808_v39  ;;  %v264_v58 = vand.u32 2147483647, %v818_v45 }
  0x31   : > { %v229_v46 = vand.u32 2147483647, %v810_v40  ;;  %v247_v47 = vand.u32 2147483647, %v812_v41  ;;  %v265_v60 = vand.u32 2147483647, %v822_v48 }
  0x32   : > { %v230_v49 = vsub.f32 0.0, %v228_v42  ;;  %v248_v50 = vsub.f32 0.0, %v246_v43  ;;  %v266_v62 = vsub.f32 0.0, %v264_v58  ;;  %v226_v30 = vmax.f32 %v806_v38, 0.0 }
  0x33   : > { %v231_v51 = vsub.f32 0.0, %v229_v46  ;;  %v249_v52 = vsub.f32 0.0, %v247_v47  ;;  %v267_v0 = vsub.f32 0.0, %v265_v60  ;;  %v227_v32 = vmax.f32 %v810_v40, 0.0 }
  0x34   : > { %v232_v53 = vmul.f32 1.442695, %v230_v49  ;;  %v250_v54 = vmul.f32 1.442695, %v248_v50  ;;  %v268_v1 = vmul.f32 1.442695, %v266_v62 }
  0x35   : > { %v234_v56 = vmul.f32 1.442695, %v231_v51  ;;  %v252_v57 = vmul.f32 1.442695, %v249_v52  ;;  %v270_v2 = vmul.f32 1.442695, %v267_v0 }
  0x36   : > { %569 = vpow2.f32 %v232_v53  ;;  %v244_v36 = vmax.f32 %v808_v39, 0.0  ;;  %v245_v43 = vmax.f32 %v812_v41, 0.0 }
  0x37   : > { %571 = vpow2.f32 %v234_v56 }
  0x38   : > { %573 = vpow2.f32 %v250_v54 }
  0x39   : > { %575 = vpow2.f32 %v252_v57 }
  0x3a   : > { %577 = vpow2.f32 %v345_v61 }
  0x3b   : > { %579 = vpow2.f32 %v347_v63 }
  0x3c   : > { %581 = vpow2.f32 %v268_v1 }
  0x3d   : > { %583 = vpow2.f32 %v270_v2 }
  0x40   : > { %v570_v6 = vpop.eup %569 }
  0x41   : > { %v572_v15 = vpop.eup %571  ;;  %v236_v16 = vadd.f32 1.0, %v570_v6 }
  0x42   : > { %v574_v17 = vpop.eup %573  ;;  %v237_v18 = vadd.f32 1.0, %v572_v15 }
  0x43   : > { %v576_v19 = vpop.eup %575  ;;  %585 = vlog2.f32 %v236_v16  ;;  %v254_v20 = vadd.f32 1.0, %v574_v17  ;;  %v262_v16 = vmax.f32 %v818_v45, 0.0 }
  0x44   : > { %587 = vlog2.f32 %v237_v18  ;;  %v255_v21 = vadd.f32 1.0, %v576_v19  ;;  %v578_v22 = vpop.eup %577  ;;  %v263_v18 = vmax.f32 %v822_v48, 0.0 }
  0x45   : > { %589 = vlog2.f32 %v254_v20  ;;  %v580_v23 = vpop.eup %579  ;;  %v349_v24 = vsel %vm332_vm0, %v578_v22, 0.0 }
  0x46   : > { %591 = vlog2.f32 %v255_v21  ;;  %v350_v25 = vsel %vm334_vm3, %v580_v23, 0.0  ;;  %v582_v27 = vpop.eup %581 }
  0x47   : > { %v351_v26 = vadd.f32 %v350_v25, %v349_v24  ;;  %v584_v29 = vpop.eup %583  ;;  %v272_v46 = vadd.f32 1.0, %v582_v27 }
  0x48   : > { %v273_v52 = vadd.f32 1.0, %v584_v29 }
  0x49   : > { %v352_v28 = vrot.slane %v351_v26, 4  ;;  %593 = vlog2.f32 %v272_v46 }
  0x4a   : > { %595 = vlog2.f32 %v273_v52 }
  0x4b   : > { %v353_v33 = vadd.f32 %v352_v28, %v351_v26  ;;  %v296_v28 = vsub.f32 %v818_v45, %v199_v13 }
  0x4d   : > { %v586_v31 = vpop.eup %585  ;;  %v354_v47 = vrot.slane %v353_v33, 2 }
  0x4e   : > { %v588_v34 = vpop.eup %587  ;;  %v239_v35 = vmul.f32 0.6931472, %v586_v31 }
  0x4f   : > { %v590_v37 = vpop.eup %589  ;;  %v241_v42 = vmul.f32 0.6931472, %v588_v34  ;;  %v355_v57 = vadd.f32 %v354_v47, %v353_v33 }
  0x50   : > { %v592_v49 = vpop.eup %591  ;;  %v242_v50 = vadd.f32 %v239_v35, %v226_v30  ;;  %v257_v51 = vmul.f32 0.6931472, %v590_v37  ;;  %v297_v30 = vsub.f32 %v822_v48, %v200_v14 }
  0x51   : > { %v243_v53 = vadd.f32 %v241_v42, %v227_v32  ;;  %v259_v54 = vmul.f32 0.6931472, %v592_v49  ;;  %v356_v0 = vrot.slane %v355_v57, 1 }
  0x52   : > { %v836_v55 = vadd.f32 %v257_v51, %v244_v36  ;;  %v839_v56 = vsub.f32 %v806_v38, %v242_v50 }
  0x53   : > { %v841_v58 = vadd.f32 %v259_v54, %v245_v43  ;;  %v844_v59 = vsub.f32 %v810_v40, %v243_v53  ;;  %v357_v40 = vadd.f32 %v356_v0, %v355_v57  ;;  %v594_v2 = vpop.eup %593 }
  0x54   : > { %v284_v60 = vmul.f32 1.442695, %v839_v56  ;;  %v288_v61 = vsub.f32 %v808_v39, %v836_v55  ;;  %v596_v6 = vpop.eup %595  ;;  %v275_v39 = vmul.f32 0.6931472, %v594_v2  ;;  %v282_v42 = vsub.f32 0.0, %v836_v55 }
  0x55   : > { %v286_v62 = vmul.f32 1.442695, %v844_v59  ;;  %v289_v63 = vsub.f32 %v812_v41, %v841_v58  ;;  %v277_v19 = vmul.f32 0.6931472, %v596_v6  ;;  %v283_v13 = vsub.f32 0.0, %v841_v58 }
  0x56   : > { %597 = vpow2.f32 %v284_v60  ;;  %v290_v38 = vmul.f32 1.442695, %v288_v61  ;;  %v278_v22 = vadd.f32 %v275_v39, %v262_v16 }
  0x57   : > { %599 = vpow2.f32 %v286_v62  ;;  %v292_v1 = vmul.f32 1.442695, %v289_v63  ;;  %v279_v24 = vadd.f32 %v277_v19, %v263_v18 }
  0x58   : > { %601 = vpow2.f32 %v290_v38  ;;  %v298_v29 = vmul.f32 2.0, %v278_v22 }
  0x59   : > { %603 = vpow2.f32 %v292_v1  ;;  %v299_v31 = vmul.f32 2.0, %v279_v24 }
  0x5a   : > { %605 = vlog2.f32 %v357_v40  ;;  %v300_v33 = vsub.f32 %v296_v28, %v298_v29 }
  0x5b   : > { %v301_v34 = vsub.f32 %v297_v30, %v299_v31 }
  0x5c   : > { %v503_v36 = vadd.f32 -4.8481164, %v300_v33 }
  0x5d   : > { %v504_v9 = vadd.f32 -4.8481164, %v301_v34 }
  0x60   : > { %v598_v15 = vpop.eup %597 }
  0x61   : > { %v600_v17 = vpop.eup %599 }
  0x62   : > { %v602_v41 = vpop.eup %601 }
  0x63   : > { %v604_v20 = vpop.eup %603  ;;  %v294_v21 = vsub.f32 %v598_v15, %v602_v41 }
  0x64   : > { %v295_v23 = vsub.f32 %v600_v17, %v604_v20  ;;  %v606_v27 = vpop.eup %605 }
  0x65   : > { %v304_v25 = vmax.f32 %v294_v21, 1e-12  ;;  %v359_v32 = vmul.f32 0.6931472, %v606_v27  ;;  %vm302_vm4 = vcmp.gt.f32.partialorder %v294_v21, 1e-05 }
  0x66   : > { %v305_v26 = vmax.f32 %v295_v23, 1e-12  ;;  %vm303_vm5 = vcmp.gt.f32.partialorder %v295_v23, 1e-05 }
  0x67   : > { %607 = vlog2.f32 %v304_v25  ;;  %v360_v35 = vadd.f32 %v359_v32, %v816_v44 }
  0x68   : > { %609 = vlog2.f32 %v305_v26 }
  0x69   : > { %v361_v14 = vsub.f32 %v779_v4, %v360_v35  ;;  %v362_v48 = vsub.f32 %v781_v5, %v360_v35 }
  0x71   : > { %v608_v37 = vpop.eup %607 }
  0x72   : > { %v610_v43 = vpop.eup %609  ;;  %v307_v45 = vmul.f32 0.6931472, %v608_v37 }
  0x73   : > { %v309_v10 = vmul.f32 0.6931472, %v610_v43 }
  0x74   : > { %v312_v44 = vsel %vm302_vm4, %v307_v45, %v503_v36 }
  0x75   : > { %v313_v46 = vsel %vm303_vm5, %v309_v10, %v504_v9  ;;  %v321_v47 = vsel %vm320_vm6, %v282_v42, %v312_v44 }
  0x76   : > { %v322_v49 = vsel %vm320_vm6, %v283_v13, %v313_v46  ;;  %v330_v50 = vsel %vm329_vm7, %v839_v56, %v321_v47 }
  0x77   : > { %v331_v51 = vsel %vm329_vm7, %v844_v59, %v322_v49  ;;  %v363_v52 = vadd.f32 %v361_v14, %v330_v50 }
  0x78   : > { %v364_v7 = vadd.f32 %v362_v48, %v331_v51 }
  0x79   : > { %v365_v11 = vsel %vm332_vm0, %v363_v52, -inf }
  0x7a   : > { %v366_v53 = vsel %vm334_vm3, %v364_v7, -inf }
  0x7b   : > { %v367_v3 = vmax.f32 %v365_v11, %v366_v53 }
  0x7d   : > { %v368_v8 = vrot.slane %v367_v3, 4 }
  0x7f   : > { %v369_v12 = vmax.f32 %v367_v3, %v368_v8 }
  0x81   : > { %v370_v4 = vrot.slane %v369_v12, 2 }
  0x83   : > { %v371_v54 = vmax.f32 %v369_v12, %v370_v4 }
  0x85   : > { %v372_v55 = vrot.slane %v371_v54, 1 }
  0x87   : > { %v373_v5 = vmax.f32 %v371_v54, %v372_v55 }
  0x89   : > { %v374_v57 = vsub.f32 %v363_v52, %v373_v5  ;;  %v375_v58 = vsub.f32 %v364_v7, %v373_v5 }
  0x8b   : > { %v376_v60 = vmul.f32 1.442695, %v374_v57  ;;  %v378_v56 = vmul.f32 1.442695, %v375_v58 }
  0x8d   : > { %611 = vpow2.f32 %v376_v60 }
  0x8e   : > { %613 = vpow2.f32 %v378_v56 }
  0x97   : > { %v612_v59 = vpop.eup %611 }
  0x98   : > { %v614_v61 = vpop.eup %613  ;;  %v380_v62 = vsel %vm332_vm0, %v612_v59, 0.0 }
  0x99   : > { %v381_v63 = vsel %vm334_vm3, %v614_v61, 0.0 }
  0x9a   : > { %v382_v38 = vadd.f32 %v381_v63, %v380_v62 }
  0x9c   : > { %v383_v0 = vrot.slane %v382_v38, 4 }
  0x9e   : > { %v384_v1 = vadd.f32 %v383_v0, %v382_v38 }
  0xa0   : > { %v385_v40 = vrot.slane %v384_v1, 2 }
  0xa2   : > { %v386_v2 = vadd.f32 %v385_v40, %v384_v1 }
  0xa4   : > { %v387_v6 = vrot.slane %v386_v2, 1 }
  0xa6   : > { %v388_v15 = vadd.f32 %v387_v6, %v386_v2 }
  0xa8   : > { %615 = vlog2.f32 %v388_v15 }
  0xb2   : > { %v616_v16 = vpop.eup %615 }
  0xb3   : > { %v390_v39 = vmul.f32 0.6931472, %v616_v16 }
  0xb5   : > { %v391_v17 = vadd.f32 %v390_v39, %v373_v5 }
  0xb7   : > { %v392_v18 = vsub.f32 0.0, %v391_v17 }
  0xb9   : > { %394 = vst.msk [vmem:[%s176_s5] sm:$0x1] %vm393_vm8, %v392_v18 }
  0xba   : > { %630 = shalt.err (!%p627_p5)
}
  0xbb   : > { %s631_s24 = scalar_lea.hbm %s882_s15, 16  ;;  %s635_s27 = scalar_lea.hbm %s931_s2, 32 }
  0xbc   : > { %p632_p6 = scmp.ne.s32.totalorder %s882_s15, %s631_s24  ;;  %p636_p10 = scmp.lt.u32.totalorder %s882_s15, %s931_s2 }
  0xbd   : > { %p637_p11 = scmp.lt.u32.totalorder %s635_s27, %s631_s24  ;;  %p639_p13 = scmp.lt.u32.totalorder %s631_s24, %s882_s15 }
  0xbe   : > { %p633_p7 = pnand %p632_p6, %p754_p4 }
  0xbf   : > { %p638_p12 = por %p637_p11, %p636_p10 }
  0xc0   : > { %p634_p9 = pneg %p633_p7 }
  0xc1   : > { %p640_p0 = por %p639_p13, %p638_p12 }
  0xc3   : > { %p641_p1 = pnand %p640_p0, %p634_p9 }
  0xc5   : > { %644 = shalt.err (!%p641_p1)
}
  0xc6   : > { %509 = dma.vmem_to_hbm [thread:$0]  (%p754_p4), %s884_s6, 16, %s882_s15, %s396_s16  }
  0xc7 PF: > { %p515_p2 = scmp.ge.s32.totalorder %s695_s14, 2  ;;  %s421_s30 = sand.u32 1, %s675_s9  }
  0xc8   : > { %s422_s3 = scalar_lea.sflag [#allocation3], %s421_s30 }
  0xc9   : > { %p512_p3 = pnand %p515_p2, %p761_p8 }
  0xcb   : > { %670 = dma.done.wait (!%p512_p3), %s422_s3, 16  }
  0xcc   : > { %672 = vsyncadd (!%p512_p3), %s422_s3, 4294967280  ;;  %s15_s14 = sadd.s32 1, %s695_s14   ;;  %s934_s9 = smov %s679_s10 }
  0xcd   : > { %p12_p5 = scmp.ge.s32.totalorder %s15_s14, 4   ;;  %s935_s10 = smov %s683_s11 }
  0xce   : > { %s936_s11 = smov %s767_s22  ;;  %s937_s12 = smov %s691_s13 }
  0xcf   : > { %s938_s13 = smov %s940_s17  ;;  %14 = sbr.rel (!%p12_p5) target bundleno = 4 (0x4), region = 68 }
  0xd6   :  { %426 = vsyncpa [#allocation3], 1 }
  0xd7   :  { %428 = vsyncpa [#allocation3 + $0x1], 1 }

</bundles_post_ra>
